<compile_context>
chip_gen: v7x
topology: tpu7x:2x2x1
jax: 0.10.0
libtpu: 0.0.40
codegen_flags: <defaults>
</compile_context>

<pallas_src>
import jax
import jax.numpy as jnp
from jax.experimental import pallas as pl
from jax.experimental.pallas import tpu as pltpu


EPS = 1e-5
HIGHEST = jax.lax.Precision.HIGHEST   # used only by the pure-JAX reference


def mlp_kernel(x_ref, w_in_ref, w_slab_ref, b_slab_ref, o_ref):
    """Whole forward pass for one batch, fully resident in VMEM.

    w_slab_ref: [num_layers, H, H]   entries 0..L-2 are hidden layers,
                entry L-1 is the output layer (only column 0 non-zero;
                padded once at parameter-pack time).
    b_slab_ref: [num_layers+1, 1, H] entry 0 = input-layer bias,
                entries 1..L-1 = hidden biases, entry L = output bias (lane 0).
    """
    x = x_ref[...]                                   # [B, n_input]
    inv_b = 1.0 / x.shape[0]                         # static python float

    # ---- input layer + ReLU (default precision: single MXU pass) -----------
    h = jnp.dot(x, w_in_ref[...], preferred_element_type=jnp.float32)
    h = jnp.maximum(h + b_slab_ref[0], 0.0)          # [B, H]

    num_hidden = w_slab_ref.shape[0] - 1             # static (num_layers - 1)

    for i in range(num_hidden):                      # statically unrolled
        h = jnp.dot(h, w_slab_ref[i], preferred_element_type=jnp.float32)
        h = jnp.maximum(h + b_slab_ref[i + 1], 0.0)  # [B, H]

        # Training-mode BatchNorm1d stats (biased variance), one pass over h.
        mean = jnp.sum(h, axis=0, keepdims=True) * inv_b           # [1, H]
        mean_sq = jnp.sum(h * h, axis=0, keepdims=True) * inv_b    # [1, H]
        var = jnp.maximum(mean_sq - mean * mean, 0.0)  # clamp cancellation
        inv_std = jax.lax.rsqrt(var + EPS)                         # [1, H]
        # Lane-broadcast normalize (pure VPU); no weight folding / extra MXU.
        h = (h - mean) * inv_std                     # [B, H]

    # ---- output layer: last slab entry (only column 0 meaningful) ----------
    out = jnp.dot(h, w_slab_ref[num_hidden], preferred_element_type=jnp.float32)
    out = out + b_slab_ref[num_hidden + 1]           # [B, H]
    o_ref[...] = out[:, :1]                          # natural [B, 1] output


def neural_network_forward(x, packed_params):
    """Wrapper around pallas_call. `x`: [B, n_input] float32 -> [B, 1]."""
    w_in, w_slab, b_slab = packed_params
    B = x.shape[0]
    vmem = pl.BlockSpec(memory_space=pltpu.MemorySpace.VMEM)
    return pl.pallas_call(
        mlp_kernel,
        out_shape=jax.ShapeDtypeStruct((B, 1), jnp.float32),
        # 4 inputs: x, w_in, packed weight slab, packed bias slab.
        in_specs=[vmem] * 4,
        out_specs=vmem,
    )(x, w_in, w_slab, b_slab)


def init_params(key, n_input=50, num_neurons=16, num_layers=3):
    """Deterministic synthetic parameters, pre-packed for the kernel.

    Mimics PyTorch's default Linear init: U(-1/sqrt(fan_in), 1/sqrt(fan_in)).
    Weights are stored as [in, out] (transposed vs. PyTorch).  Packing /
    padding is done here ONCE, not in the per-call wrapper.
    """
    ks = jax.random.split(key, 5)
    H = num_neurons

    def lin(kw, kb, fan_in, fan_out):
        bound = 1.0 / jnp.sqrt(jnp.float32(fan_in))
        w = jax.random.uniform(kw, (fan_in, fan_out), jnp.float32, -bound, bound)
        b = jax.random.uniform(kb, (1, fan_out), jnp.float32, -bound, bound)
        return w, b

    w_in, b_in = lin(ks[0], ks[1], n_input, H)

    num_hidden = num_layers - 1
    dkeys = jax.random.split(ks[2], max(2 * num_hidden, 2))
    hidden_ws, hidden_bs = [], []
    for i in range(num_hidden):
        w, b = lin(dkeys[2 * i], dkeys[2 * i + 1], H, H)
        hidden_ws.append(w)
        hidden_bs.append(b)

    w_out, b_out = lin(ks[3], ks[4], H, 1)

    # Pack: output layer zero-padded to [H, H] / [1, H] (column 0 only).
    w_out_pad = jnp.zeros((H, H), jnp.float32).at[:, :1].set(w_out)
    b_out_pad = jnp.zeros((1, H), jnp.float32).at[:, :1].set(b_out)
    w_slab = jnp.stack(hidden_ws + [w_out_pad], axis=0)           # [L, H, H]
    b_slab = jnp.stack([b_in] + hidden_bs + [b_out_pad], axis=0)  # [L+1, 1, H]

    return w_in, w_slab, b_slab


def reference_forward(x, packed_params):
    """Pure-JAX reference (PyTorch training-mode BN semantics), f32 HIGHEST."""
    w_in, w_slab, b_slab = packed_params
    num_hidden = w_slab.shape[0] - 1
    h = jnp.maximum(jnp.dot(x, w_in, precision=HIGHEST) + b_slab[0], 0.0)
    for i in range(num_hidden):
        h = jnp.maximum(
            jnp.dot(h, w_slab[i], precision=HIGHEST) + b_slab[i + 1], 0.0)
        mean = jnp.mean(h, axis=0, keepdims=True)
        var = jnp.mean((h - mean) ** 2, axis=0, keepdims=True)   # biased var
        h = (h - mean) * jax.lax.rsqrt(var + EPS)                # gamma=1, beta=0
    return (jnp.dot(h, w_slab[num_hidden, :, :1], precision=HIGHEST)
            + b_slab[num_hidden + 1, :, :1])


if __name__ == "__main__":
    key = jax.random.PRNGKey(0)
    k_x, k_p = jax.random.split(key)

    # Module defaults (n_input=50, H=16, 3 layers); batch chosen MXU-row-aligned.
    B, N_INPUT, NUM_NEURONS, NUM_LAYERS = 128, 50, 16, 3
    x = jax.random.normal(k_x, (B, N_INPUT), dtype=jnp.float32)
    params = init_params(k_p, N_INPUT, NUM_NEURONS, NUM_LAYERS)

    out = jax.block_until_ready(neural_network_forward(x, params))

    ref = reference_forward(x, params)
    assert out.shape == (B, 1)
    # Kernel matmuls run at default TPU precision (single bf16 MXU pass) while
    # the reference is f32-HIGHEST, so allow bf16-scale tolerance.
    assert jnp.allclose(out, ref, atol=5e-2, rtol=5e-2), (out[:4], ref[:4])

    print("KERNEL_OK")
</pallas_src>

<mosaic_0001>
module attributes {stable_mosaic.version = 11 : i64} {
  func.func @mlp_kernel(%arg0: memref<128x50xf32, #tpu.memory_space<vmem>>, %arg1: memref<50x16xf32, #tpu.memory_space<vmem>>, %arg2: memref<3x16x16xf32, #tpu.memory_space<vmem>>, %arg3: memref<4x1x16xf32, #tpu.memory_space<vmem>>, %arg4: memref<128x1xf32, #tpu.memory_space<vmem>>) attributes {dimension_semantics = [], scalar_prefetch = 0 : i64, scratch_operands = 0 : i64, tpu.core_type = #tpu.core_type<tc>} {
    %c0 = arith.constant 0 : index
    %c0_0 = arith.constant 0 : index
    %0 = vector.load %arg0[%c0, %c0_0] : memref<128x50xf32, #tpu.memory_space<vmem>>, vector<128x50xf32>
    %c0_1 = arith.constant 0 : index
    %c0_2 = arith.constant 0 : index
    %1 = vector.load %arg1[%c0_1, %c0_2] : memref<50x16xf32, #tpu.memory_space<vmem>>, vector<50x16xf32>
    %cst = arith.constant dense<0.000000e+00> : vector<128x16xf32>
    %2 = tpu.matmul %0, %1, %cst {dimension_numbers = #tpu.dot_dimension_numbers<[1], [0], [0], [1], [0, 0, 1, 1], [], []>} : vector<128x50xf32>, vector<50x16xf32>, vector<128x16xf32> -> vector<128x16xf32>
    %c0_3 = arith.constant 0 : index
    %c0_4 = arith.constant 0 : index
    %c0_5 = arith.constant 0 : index
    %3 = vector.load %arg3[%c0_3, %c0_4, %c0_5] : memref<4x1x16xf32, #tpu.memory_space<vmem>>, vector<1x1x16xf32>
    %4 = vector.shape_cast %3 : vector<1x1x16xf32> to vector<1x16xf32>
    %5 = vector.broadcast %4 : vector<1x16xf32> to vector<128x16xf32>
    %6 = arith.addf %2, %5 : vector<128x16xf32>
    %cst_6 = arith.constant 0.000000e+00 : f32
    %7 = vector.broadcast %cst_6 : f32 to vector<128x16xf32>
    %8 = arith.maximumf %6, %7 : vector<128x16xf32>
    %c0_7 = arith.constant 0 : index
    %c0_8 = arith.constant 0 : index
    %c0_9 = arith.constant 0 : index
    %9 = vector.load %arg2[%c0_7, %c0_8, %c0_9] : memref<3x16x16xf32, #tpu.memory_space<vmem>>, vector<1x16x16xf32>
    %10 = vector.shape_cast %9 : vector<1x16x16xf32> to vector<16x16xf32>
    %cst_10 = arith.constant dense<0.000000e+00> : vector<128x16xf32>
    %11 = tpu.matmul %8, %10, %cst_10 {dimension_numbers = #tpu.dot_dimension_numbers<[1], [0], [0], [1], [0, 0, 1, 1], [], []>} : vector<128x16xf32>, vector<16x16xf32>, vector<128x16xf32> -> vector<128x16xf32>
    %c1 = arith.constant 1 : index
    %c0_11 = arith.constant 0 : index
    %c0_12 = arith.constant 0 : index
    %12 = vector.load %arg3[%c1, %c0_11, %c0_12] : memref<4x1x16xf32, #tpu.memory_space<vmem>>, vector<1x1x16xf32>
    %13 = vector.shape_cast %12 : vector<1x1x16xf32> to vector<1x16xf32>
    %14 = vector.broadcast %13 : vector<1x16xf32> to vector<128x16xf32>
    %15 = arith.addf %11, %14 : vector<128x16xf32>
    %cst_13 = arith.constant 0.000000e+00 : f32
    %16 = vector.broadcast %cst_13 : f32 to vector<128x16xf32>
    %17 = arith.maximumf %15, %16 : vector<128x16xf32>
    %cst_14 = arith.constant dense<0.000000e+00> : vector<16xf32>
    %18 = vector.multi_reduction <add>, %17, %cst_14 [0] : vector<128x16xf32> to vector<16xf32>
    %19 = vector.shape_cast %18 : vector<16xf32> to vector<1x16xf32>
    %cst_15 = arith.constant 7.812500e-03 : f32
    %20 = vector.broadcast %cst_15 : f32 to vector<1x16xf32>
    %21 = arith.mulf %19, %20 : vector<1x16xf32>
    %22 = arith.mulf %17, %17 : vector<128x16xf32>
    %cst_16 = arith.constant dense<0.000000e+00> : vector<16xf32>
    %23 = vector.multi_reduction <add>, %22, %cst_16 [0] : vector<128x16xf32> to vector<16xf32>
    %24 = vector.shape_cast %23 : vector<16xf32> to vector<1x16xf32>
    %cst_17 = arith.constant 7.812500e-03 : f32
    %25 = vector.broadcast %cst_17 : f32 to vector<1x16xf32>
    %26 = arith.mulf %24, %25 : vector<1x16xf32>
    %27 = arith.mulf %21, %21 : vector<1x16xf32>
    %28 = arith.subf %26, %27 : vector<1x16xf32>
    %cst_18 = arith.constant 0.000000e+00 : f32
    %29 = vector.broadcast %cst_18 : f32 to vector<1x16xf32>
    %30 = arith.maximumf %28, %29 : vector<1x16xf32>
    %cst_19 = arith.constant 9.99999974E-6 : f32
    %31 = vector.broadcast %cst_19 : f32 to vector<1x16xf32>
    %32 = arith.addf %30, %31 : vector<1x16xf32>
    %33 = math.rsqrt %32 : vector<1x16xf32>
    %34 = vector.broadcast %21 : vector<1x16xf32> to vector<128x16xf32>
    %35 = arith.subf %17, %34 : vector<128x16xf32>
    %36 = vector.broadcast %33 : vector<1x16xf32> to vector<128x16xf32>
    %37 = arith.mulf %35, %36 : vector<128x16xf32>
    %c1_20 = arith.constant 1 : index
    %c0_21 = arith.constant 0 : index
    %c0_22 = arith.constant 0 : index
    %38 = vector.load %arg2[%c1_20, %c0_21, %c0_22] : memref<3x16x16xf32, #tpu.memory_space<vmem>>, vector<1x16x16xf32>
    %39 = vector.shape_cast %38 : vector<1x16x16xf32> to vector<16x16xf32>
    %cst_23 = arith.constant dense<0.000000e+00> : vector<128x16xf32>
    %40 = tpu.matmul %37, %39, %cst_23 {dimension_numbers = #tpu.dot_dimension_numbers<[1], [0], [0], [1], [0, 0, 1, 1], [], []>} : vector<128x16xf32>, vector<16x16xf32>, vector<128x16xf32> -> vector<128x16xf32>
    %c2 = arith.constant 2 : index
    %c0_24 = arith.constant 0 : index
    %c0_25 = arith.constant 0 : index
    %41 = vector.load %arg3[%c2, %c0_24, %c0_25] : memref<4x1x16xf32, #tpu.memory_space<vmem>>, vector<1x1x16xf32>
    %42 = vector.shape_cast %41 : vector<1x1x16xf32> to vector<1x16xf32>
    %43 = vector.broadcast %42 : vector<1x16xf32> to vector<128x16xf32>
    %44 = arith.addf %40, %43 : vector<128x16xf32>
    %cst_26 = arith.constant 0.000000e+00 : f32
    %45 = vector.broadcast %cst_26 : f32 to vector<128x16xf32>
    %46 = arith.maximumf %44, %45 : vector<128x16xf32>
    %cst_27 = arith.constant dense<0.000000e+00> : vector<16xf32>
    %47 = vector.multi_reduction <add>, %46, %cst_27 [0] : vector<128x16xf32> to vector<16xf32>
    %48 = vector.shape_cast %47 : vector<16xf32> to vector<1x16xf32>
    %cst_28 = arith.constant 7.812500e-03 : f32
    %49 = vector.broadcast %cst_28 : f32 to vector<1x16xf32>
    %50 = arith.mulf %48, %49 : vector<1x16xf32>
    %51 = arith.mulf %46, %46 : vector<128x16xf32>
    %cst_29 = arith.constant dense<0.000000e+00> : vector<16xf32>
    %52 = vector.multi_reduction <add>, %51, %cst_29 [0] : vector<128x16xf32> to vector<16xf32>
    %53 = vector.shape_cast %52 : vector<16xf32> to vector<1x16xf32>
    %cst_30 = arith.constant 7.812500e-03 : f32
    %54 = vector.broadcast %cst_30 : f32 to vector<1x16xf32>
    %55 = arith.mulf %53, %54 : vector<1x16xf32>
    %56 = arith.mulf %50, %50 : vector<1x16xf32>
    %57 = arith.subf %55, %56 : vector<1x16xf32>
    %cst_31 = arith.constant 0.000000e+00 : f32
    %58 = vector.broadcast %cst_31 : f32 to vector<1x16xf32>
    %59 = arith.maximumf %57, %58 : vector<1x16xf32>
    %cst_32 = arith.constant 9.99999974E-6 : f32
    %60 = vector.broadcast %cst_32 : f32 to vector<1x16xf32>
    %61 = arith.addf %59, %60 : vector<1x16xf32>
    %62 = math.rsqrt %61 : vector<1x16xf32>
    %63 = vector.broadcast %50 : vector<1x16xf32> to vector<128x16xf32>
    %64 = arith.subf %46, %63 : vector<128x16xf32>
    %65 = vector.broadcast %62 : vector<1x16xf32> to vector<128x16xf32>
    %66 = arith.mulf %64, %65 : vector<128x16xf32>
    %c2_33 = arith.constant 2 : index
    %c0_34 = arith.constant 0 : index
    %c0_35 = arith.constant 0 : index
    %67 = vector.load %arg2[%c2_33, %c0_34, %c0_35] : memref<3x16x16xf32, #tpu.memory_space<vmem>>, vector<1x16x16xf32>
    %68 = vector.shape_cast %67 : vector<1x16x16xf32> to vector<16x16xf32>
    %cst_36 = arith.constant dense<0.000000e+00> : vector<128x16xf32>
    %69 = tpu.matmul %66, %68, %cst_36 {dimension_numbers = #tpu.dot_dimension_numbers<[1], [0], [0], [1], [0, 0, 1, 1], [], []>} : vector<128x16xf32>, vector<16x16xf32>, vector<128x16xf32> -> vector<128x16xf32>
    %c3 = arith.constant 3 : index
    %c0_37 = arith.constant 0 : index
    %c0_38 = arith.constant 0 : index
    %70 = vector.load %arg3[%c3, %c0_37, %c0_38] : memref<4x1x16xf32, #tpu.memory_space<vmem>>, vector<1x1x16xf32>
    %71 = vector.shape_cast %70 : vector<1x1x16xf32> to vector<1x16xf32>
    %72 = vector.broadcast %71 : vector<1x16xf32> to vector<128x16xf32>
    %73 = arith.addf %69, %72 : vector<128x16xf32>
    %74 = vector.extract_strided_slice %73 {offsets = [0, 0], sizes = [128, 1], strides = [1, 1]} : vector<128x16xf32> to vector<128x1xf32>
    %c0_39 = arith.constant 0 : index
    %c0_40 = arith.constant 0 : index
    %75 = vector.load %arg4[%c0_39, %c0_40] : memref<128x1xf32, #tpu.memory_space<vmem>>, vector<128x1xf32>
    tpu.vector_store %arg4[%c0_39, %c0_40], %74 {strides = array<i32>} : memref<128x1xf32, #tpu.memory_space<vmem>>, vector<128x1xf32>,
    return
  }
}

</mosaic_0001>

<bundles_post_ra>
// kernel: tpu_custom_call.1
= control target key start
LH: loop header
LB: loop body
LE: loop exit
PB: predicated region body
PF: predicated region fallthrough
CT: control target
= control target key end

     0   :  { %vm47_vm0 = vcmask 408576   ;;  %vm96_vm1 = vcmask 1041408   ;;  %vm271_vm2 = vcmask 130048   ;;  %vm1163_vm3 = vcmask 7168   ;;  %s2021_s1 = inlined_call_operand.vmem [shape: f32[50,16], index: 1, kind: input, shape index: {}]   ;;  %s2022_s0 = inlined_call_operand.vmem [shape: f32[128,50], index: 0, kind: input, shape index: {}]   ;;  %s2023_s2 = inlined_call_operand.vmem [shape: f32[3,16,16], index: 2, kind: input, shape index: {}]   ;;  %s2024_s3 = inlined_call_operand.vmem [shape: f32[4,1,16], index: 3, kind: input, shape index: {}]   ;;  %s2025_s4 = inlined_call_operand.vmem [shape: f32[128,1], index: 4, kind: output, shape index: {}]  }
   0x1   :  { %v33_v0 = vld [vmem:[%s2021_s1] sm:$0xff]  ;;  %v34_v1 = vld [vmem:[%s2021_s1 + $0x8] sm:$0xff]  ;;  %v35_v2 = vld [vmem:[%s2021_s1 + $0x10] sm:$0xff] }
   0x2   :  { %v1459_v3 = vpack.c.bf16 %v34_v1, %v33_v0  ;;  %v36_v4 = vld [vmem:[%s2021_s1 + $0x18] sm:$0xff]  ;;  %v37_v6 = vld [vmem:[%s2021_s1 + $0x20] sm:$0xff]  ;;  %v38_v7 = vld [vmem:[%s2021_s1 + $0x28] sm:$0xff] }
   0x3   :  { %v1463_v5 = vpack.c.bf16 %v36_v4, %v35_v2  ;;  %v17_v8 = vld [vmem:[%s2022_s0] sm:$0xff]  ;;  %v1467_v9 = vpack.c.bf16 %v38_v7, %v37_v6  ;;  %v39_v10 = vld [vmem:[%s2021_s1 + $0x30] sm:$0x3]  ;;  %v18_v11 = vld [vmem:[%s2022_s0 + $0x8] sm:$0xff] }
   0x4   :  { %1460 = vmatprep.subr.bf16.mxu0 %v1459_v3  ;;  %1351 = vmatprep.mubr.msk.f32.mxu0 %vm47_vm0, %v17_v8  ;;  %v19_v12 = vld [vmem:[%s2022_s0 + $0x10] sm:$0xff]  ;;  %v20_v13 = vld [vmem:[%s2022_s0 + $0x18] sm:$0xff]  ;;  %v21_v14 = vld [vmem:[%s2022_s0 + $0x20] sm:$0xff] }
   0x5   :  { %1462 = vmatpush3.bf16.msra.mxu0 %v1459_v3  ;;  %v22_v15 = vld [vmem:[%s2022_s0 + $0x28] sm:$0xff]  ;;  %v23_v16 = vld [vmem:[%s2022_s0 + $0x30] sm:$0xff]  ;;  %v24_v17 = vld [vmem:[%s2022_s0 + $0x38] sm:$0xff] }
   0x6   :  { %1464 = vmatprep.subr.bf16.mxu0 %v1463_v5  ;;  %v25_v18 = vld [vmem:[%s2022_s0 + $0x40] sm:$0xff]  ;;  %v26_v19 = vld [vmem:[%s2022_s0 + $0x48] sm:$0xff]  ;;  %v27_v20 = vld [vmem:[%s2022_s0 + $0x50] sm:$0xff] }
   0x7   :  { %v28_v21 = vld [vmem:[%s2022_s0 + $0x58] sm:$0xff]  ;;  %v29_v22 = vld [vmem:[%s2022_s0 + $0x60] sm:$0xff]  ;;  %v30_v23 = vld [vmem:[%s2022_s0 + $0x68] sm:$0xff] }
   0x8   :  { %v31_v24 = vld [vmem:[%s2022_s0 + $0x70] sm:$0xff]  ;;  %v32_v25 = vld [vmem:[%s2022_s0 + $0x78] sm:$0xff]  ;;  %v261_v26 = vld [vmem:[%s2023_s2] sm:$0xff] }
   0x9   :  { %1466 = vmatpush3.bf16.msra.mxu0 %v1463_v5  ;;  %v262_v27 = vld [vmem:[%s2023_s2 + $0x8] sm:$0xff]  ;;  %v1184_v29 = vld [vmem:[%s2024_s3] ss:$0 sm:$0xff] }
   0xa   :  { %1468 = vmatprep.subr.bf16.mxu0 %v1467_v9  ;;  %v1471_v28 = vpack.c.bf16 %v262_v27, %v261_v26 }
   0xc   :  { %1472 = vmatprep.subr.bf16.mxu1 %v1471_v28 }
   0xd   :  { %1470 = vmatpush3.bf16.msra.mxu0 %v1467_v9  ;;  %1474 = vmatpush3.bf16.msra.mxu1 %v1471_v28 }
   0xe   :  { %1349 = vmatprep.subr.msk.mxu0 %vm96_vm1, %v39_v10 }
  0x11   :  { %1350 = vmatpush3.msk.msra.mxu0 %vm96_vm1, %v39_v10 }
  0x12   :  { %1352 = vmatmul.mubr.msk.f32.vlgmr.msra.gmra.mrb[0].mxu0 %vm47_vm0, %v18_v11 }
  0x13   :  { %1354 = vmatprep.mubr.msk.f32.mxu0 %vm47_vm0, %v19_v12 }
  0x16   :  { %1355 = vmatmul.mubr.msk.f32.gmra.mrb[2].mxu0 %vm47_vm0, %v20_v13 }
  0x17   :  { %1357 = vmatprep.mubr.msk.f32.mxu0 %vm47_vm0, %v21_v14  ;;  %v1220_v14 = vld [vmem:[%s2023_s2 + $0x10] sm:$0xff] }
  0x1a   :  { %1358 = vmatmul.mubr.msk.f32.gmra.mrb[4].mxu0 %vm47_vm0, %v22_v15  ;;  %v1221_v15 = vld [vmem:[%s2023_s2 + $0x18] sm:$0xff] }
  0x1b   :  { %1360 = vmatprep.mubr.msk.f32.mxu0 %vm47_vm0, %v23_v16  ;;  %v1475_v16 = vpack.c.bf16 %v1221_v15, %v1220_v14 }
  0x1d   :  { %1476 = vmatprep.subr.bf16.mxu1 %v1475_v16 }
  0x1e   :  { %1361 = vmatmul.mubr.msk.f32.gmra.mrb[6].mxu0 %vm47_vm0, %v24_v17  ;;  %v1633_v17 = vld [vmem:[%s2024_s3 + $0x1] ss:$0 sm:$0xff] }
  0x1f   :  { %1363 = vmatprep.mubr.msk.f32.mxu0 %vm47_vm0, %v25_v18 }
  0x22   :  { %1364 = vmatmul.mubr.msk.f32.gmra.mrb[8].mxu0 %vm47_vm0, %v26_v19 }
  0x23   :  { %1366 = vmatprep.mubr.msk.f32.mxu0 %vm47_vm0, %v27_v20 }
  0x26   :  { %1367 = vmatmul.mubr.msk.f32.gmra.mrb[10].mxu0 %vm47_vm0, %v28_v21 }
  0x27   :  { %1369 = vmatprep.mubr.msk.f32.mxu0 %vm47_vm0, %v29_v22 }
  0x2a   :  { %1370 = vmatmul.mubr.msk.f32.gmra.mrb[12].mxu0 %vm47_vm0, %v30_v23 }
  0x2b   :  { %1372 = vmatprep.mubr.msk.f32.mxu0 %vm47_vm0, %v31_v24 }
  0x2e   :  { %1373 = vmatmul.mubr.msk.f32.gmra.mrb[14].mxu0 %vm47_vm0, %v32_v25 }
  0xe5   :  { %v1353_v30 = vpop.f32.mrb[0].mxu0 }
  0xe6   :  { %v172_v31 = vadd.f32 %v1353_v30, %v1184_v29  ;;  %v166_v32 = vpop.f32.mrb[1].mxu0 }
  0xe7   :  { %v167_v33 = vadd.f32 %v1184_v29, %v166_v32 }
  0xe8   :  { %v246_v36 = vmax.f32 %v172_v31, 0.0 }
  0xe9   :  { %v245_v34 = vmax.f32 %v167_v33, 0.0  ;;  %v1356_v35 = vpop.f32.mrb[2].mxu0 }
  0xea   :  { %v182_v37 = vadd.f32 %v1356_v35, %v1184_v29  ;;  %v176_v38 = vpop.f32.mrb[3].mxu0 }
  0xeb   :  { %v177_v39 = vadd.f32 %v1184_v29, %v176_v38  ;;  %1379 = vmatprep.mubr.msk.f32.mxu1 %vm271_vm2, %v245_v34 }
  0xec   :  { %1380 = vmatmul.mubr.msk.f32.vlgmr.msra.gmra.mrb[0].mxu1 %vm271_vm2, %v246_v36  ;;  %v248_v42 = vmax.f32 %v182_v37, 0.0 }
  0xed   :  { %v247_v40 = vmax.f32 %v177_v39, 0.0  ;;  %v1359_v41 = vpop.f32.mrb[4].mxu0  ;;  %1478 = vmatpush3.bf16.msra.mxu1 %v1475_v16 }
  0xee   :  { %v192_v43 = vadd.f32 %v1359_v41, %v1184_v29  ;;  %v186_v44 = vpop.f32.mrb[5].mxu0 }
  0xef   :  { %v187_v45 = vadd.f32 %v1184_v29, %v186_v44  ;;  %1382 = vmatprep.mubr.msk.f32.mxu1 %vm271_vm2, %v247_v40 }
  0xf0   :  { %1383 = vmatmul.mubr.msk.f32.gmra.mrb[2].mxu1 %vm271_vm2, %v248_v42  ;;  %v250_v48 = vmax.f32 %v192_v43, 0.0 }
  0xf1   :  { %v249_v46 = vmax.f32 %v187_v45, 0.0  ;;  %v1362_v47 = vpop.f32.mrb[6].mxu0 }
  0xf2   :  { %v202_v49 = vadd.f32 %v1362_v47, %v1184_v29  ;;  %v196_v50 = vpop.f32.mrb[7].mxu0 }
  0xf3   :  { %v197_v51 = vadd.f32 %v1184_v29, %v196_v50  ;;  %1385 = vmatprep.mubr.msk.f32.mxu1 %vm271_vm2, %v249_v46 }
  0xf4   :  { %1386 = vmatmul.mubr.msk.f32.gmra.mrb[4].mxu1 %vm271_vm2, %v250_v48  ;;  %v252_v54 = vmax.f32 %v202_v49, 0.0 }
  0xf5   :  { %v251_v52 = vmax.f32 %v197_v51, 0.0  ;;  %v1365_v53 = vpop.f32.mrb[8].mxu0 }
  0xf6   :  { %v212_v55 = vadd.f32 %v1365_v53, %v1184_v29  ;;  %v206_v56 = vpop.f32.mrb[9].mxu0 }
  0xf7   :  { %v207_v57 = vadd.f32 %v1184_v29, %v206_v56  ;;  %1388 = vmatprep.mubr.msk.f32.mxu1 %vm271_vm2, %v251_v52 }
  0xf8   :  { %1389 = vmatmul.mubr.msk.f32.gmra.mrb[6].mxu1 %vm271_vm2, %v252_v54  ;;  %v254_v60 = vmax.f32 %v212_v55, 0.0 }
  0xf9   :  { %v253_v58 = vmax.f32 %v207_v57, 0.0  ;;  %v1368_v59 = vpop.f32.mrb[10].mxu0 }
  0xfa   :  { %v222_v61 = vadd.f32 %v1368_v59, %v1184_v29  ;;  %v216_v62 = vpop.f32.mrb[11].mxu0 }
  0xfb   :  { %v217_v63 = vadd.f32 %v1184_v29, %v216_v62  ;;  %1391 = vmatprep.mubr.msk.f32.mxu1 %vm271_vm2, %v253_v58 }
  0xfc   :  { %1392 = vmatmul.mubr.msk.f32.gmra.mrb[8].mxu1 %vm271_vm2, %v254_v60  ;;  %v256_v2 = vmax.f32 %v222_v61, 0.0 }
  0xfd   :  { %v255_v0 = vmax.f32 %v217_v63, 0.0  ;;  %v1371_v1 = vpop.f32.mrb[12].mxu0 }
  0xfe   :  { %v232_v3 = vadd.f32 %v1371_v1, %v1184_v29  ;;  %v226_v4 = vpop.f32.mrb[13].mxu0 }
  0xff   :  { %v227_v5 = vadd.f32 %v1184_v29, %v226_v4  ;;  %1394 = vmatprep.mubr.msk.f32.mxu1 %vm271_vm2, %v255_v0 }
 0x100   :  { %1395 = vmatmul.mubr.msk.f32.gmra.mrb[10].mxu1 %vm271_vm2, %v256_v2  ;;  %v258_v8 = vmax.f32 %v232_v3, 0.0 }
 0x101   :  { %v257_v6 = vmax.f32 %v227_v5, 0.0  ;;  %v1374_v7 = vpop.f32.mrb[14].mxu0 }
 0x102   :  { %v242_v9 = vadd.f32 %v1374_v7, %v1184_v29  ;;  %v236_v10 = vpop.f32.mrb[15].mxu0 }
 0x103   :  { %v237_v11 = vadd.f32 %v1184_v29, %v236_v10  ;;  %1397 = vmatprep.mubr.msk.f32.mxu1 %vm271_vm2, %v257_v6 }
 0x104   :  { %1398 = vmatmul.mubr.msk.f32.gmra.mrb[12].mxu1 %vm271_vm2, %v258_v8  ;;  %v260_v13 = vmax.f32 %v242_v9, 0.0 }
 0x105   :  { %v259_v12 = vmax.f32 %v237_v11, 0.0 }
 0x107   :  { %1400 = vmatprep.mubr.msk.f32.mxu1 %vm271_vm2, %v259_v12 }
 0x108   :  { %1401 = vmatmul.mubr.msk.f32.gmra.mrb[14].mxu1 %vm271_vm2, %v260_v13 }
 0x1bf   :  { %v1381_v18 = vpop.f32.mrb[0].mxu1 }
 0x1c0   :  { %v392_v19 = vadd.f32 %v1381_v18, %v1633_v17  ;;  %v386_v20 = vpop.f32.mrb[1].mxu1 }
 0x1c1   :  { %v387_v21 = vadd.f32 %v1633_v17, %v386_v20 }
 0x1c2   :  { %v1637_v22 = vmax.f32 %v392_v19, 0.0 }
 0x1c3   :  { %v1639_v23 = vmax.f32 %v387_v21, 0.0  ;;  %v1384_v24 = vpop.f32.mrb[2].mxu1 }
 0x1c4   :  { %v482_v25 = vsel %vm271_vm2, %v1637_v22, 0.0  ;;  %v520_v26 = vmul.f32 %v1637_v22, %v1637_v22  ;;  %v402_v27 = vadd.f32 %v1384_v24, %v1633_v17  ;;  %v396_v28 = vpop.f32.mrb[3].mxu1 }
 0x1c5   :  { %v481_v29 = vsel %vm271_vm2, %v1639_v23, 0.0  ;;  %v519_v30 = vmul.f32 %v1639_v23, %v1639_v23  ;;  %v397_v31 = vadd.f32 %v1633_v17, %v396_v28 }
 0x1c6   :  { %v536_v32 = vsel %vm271_vm2, %v520_v26, 0.0  ;;  %v483_v33 = vadd.f32 %v482_v25, %v481_v29  ;;  %v1652_v34 = vmax.f32 %v402_v27, 0.0 }
 0x1c7   :  { %v535_v35 = vsel %vm271_vm2, %v519_v30, 0.0  ;;  %v1655_v36 = vmax.f32 %v397_v31, 0.0  ;;  %v1387_v37 = vpop.f32.mrb[4].mxu1 }
 0x1c8   :  { %v537_v38 = vadd.f32 %v536_v32, %v535_v35  ;;  %v522_v39 = vmul.f32 %v1652_v34, %v1652_v34  ;;  %v412_v40 = vadd.f32 %v1387_v37, %v1633_v17  ;;  %v406_v41 = vpop.f32.mrb[5].mxu1  ;;  %v486_v47 = vsel %vm271_vm2, %v1652_v34, 0.0 }
 0x1c9   :  { %v484_v42 = vsel %vm271_vm2, %v1655_v36, 0.0  ;;  %v521_v43 = vmul.f32 %v1655_v36, %v1655_v36  ;;  %v407_v44 = vadd.f32 %v1633_v17, %v406_v41 }
 0x1ca   :  { %v485_v45 = vadd.f32 %v484_v42, %v483_v33  ;;  %v1665_v46 = vmax.f32 %v412_v40, 0.0  ;;  %v540_v51 = vsel %vm271_vm2, %v522_v39, 0.0 }
 0x1cb   :  { %v538_v48 = vsel %vm271_vm2, %v521_v43, 0.0  ;;  %v1670_v49 = vmax.f32 %v407_v44, 0.0  ;;  %v1390_v50 = vpop.f32.mrb[6].mxu1 }
 0x1cc   :  { %v539_v52 = vadd.f32 %v538_v48, %v537_v38  ;;  %v524_v53 = vmul.f32 %v1665_v46, %v1665_v46  ;;  %v487_v54 = vadd.f32 %v486_v47, %v485_v45  ;;  %v416_v55 = vpop.f32.mrb[7].mxu1  ;;  %v422_v58 = vadd.f32 %v1390_v50, %v1633_v17 }
 0x1cd   :  { %v488_v56 = vsel %vm271_vm2, %v1670_v49, 0.0  ;;  %v523_v57 = vmul.f32 %v1670_v49, %v1670_v49  ;;  %v417_v59 = vadd.f32 %v1633_v17, %v416_v55  ;;  %v490_v62 = vsel %vm271_vm2, %v1665_v46, 0.0 }
 0x1ce   :  { %v489_v60 = vadd.f32 %v488_v56, %v487_v54  ;;  %v541_v61 = vadd.f32 %v540_v51, %v539_v52  ;;  %v1684_v0 = vmax.f32 %v422_v58, 0.0  ;;  %v544_v7 = vsel %vm271_vm2, %v524_v53, 0.0 }
 0x1cf   :  { %v542_v63 = vsel %vm271_vm2, %v523_v57, 0.0  ;;  %v1686_v1 = vmax.f32 %v417_v59, 0.0  ;;  %v1393_v2 = vpop.f32.mrb[8].mxu1 }
 0x1d0   :  { %v543_v3 = vadd.f32 %v542_v63, %v541_v61  ;;  %v491_v4 = vadd.f32 %v490_v62, %v489_v60  ;;  %v432_v5 = vadd.f32 %v1393_v2, %v1633_v17  ;;  %v426_v6 = vpop.f32.mrb[9].mxu1  ;;  %v526_v8 = vmul.f32 %v1684_v0, %v1684_v0 }
 0x1d1   :  { %v492_v9 = vsel %vm271_vm2, %v1686_v1, 0.0  ;;  %v525_v10 = vmul.f32 %v1686_v1, %v1686_v1  ;;  %v427_v14 = vadd.f32 %v1633_v17, %v426_v6  ;;  %v494_v18 = vsel %vm271_vm2, %v1684_v0, 0.0 }
 0x1d2   :  { %v493_v11 = vadd.f32 %v492_v9, %v491_v4  ;;  %v545_v12 = vadd.f32 %v544_v7, %v543_v3  ;;  %v1696_v13 = vmax.f32 %v432_v5, 0.0  ;;  %v548_v19 = vsel %vm271_vm2, %v526_v8, 0.0 }
 0x1d3   :  { %v546_v15 = vsel %vm271_vm2, %v525_v10, 0.0  ;;  %v1396_v16 = vpop.f32.mrb[10].mxu1  ;;  %v1703_v21 = vmax.f32 %v427_v14, 0.0 }
 0x1d4   :  { %v547_v20 = vadd.f32 %v546_v15, %v545_v12  ;;  %v436_v24 = vpop.f32.mrb[11].mxu1  ;;  %v528_v25 = vmul.f32 %v1696_v13, %v1696_v13  ;;  %v495_v26 = vadd.f32 %v494_v18, %v493_v11  ;;  %v442_v27 = vadd.f32 %v1396_v16, %v1633_v17 }
 0x1d5   :  { %v437_v28 = vadd.f32 %v1633_v17, %v436_v24  ;;  %v496_v29 = vsel %vm271_vm2, %v1703_v21, 0.0  ;;  %v527_v30 = vmul.f32 %v1703_v21, %v1703_v21  ;;  %v498_v38 = vsel %vm271_vm2, %v1696_v13, 0.0 }
 0x1d6   :  { %v549_v31 = vadd.f32 %v548_v19, %v547_v20  ;;  %v497_v32 = vadd.f32 %v496_v29, %v495_v26  ;;  %v1713_v33 = vmax.f32 %v442_v27, 0.0  ;;  %v552_v42 = vsel %vm271_vm2, %v528_v25, 0.0 }
 0x1d7   :  { %v1715_v35 = vmax.f32 %v437_v28, 0.0  ;;  %v1399_v37 = vpop.f32.mrb[12].mxu1  ;;  %v550_v39 = vsel %vm271_vm2, %v527_v30, 0.0 }
 0x1d8   :  { %v452_v40 = vadd.f32 %v1399_v37, %v1633_v17  ;;  %v446_v41 = vpop.f32.mrb[13].mxu1  ;;  %v551_v43 = vadd.f32 %v550_v39, %v549_v31  ;;  %v530_v44 = vmul.f32 %v1713_v33, %v1713_v33  ;;  %v499_v45 = vadd.f32 %v498_v38, %v497_v32 }
 0x1d9   :  { %v500_v47 = vsel %vm271_vm2, %v1715_v35, 0.0  ;;  %v529_v48 = vmul.f32 %v1715_v35, %v1715_v35  ;;  %v447_v51 = vadd.f32 %v1633_v17, %v446_v41  ;;  %v502_v55 = vsel %vm271_vm2, %v1713_v33, 0.0 }
 0x1da   :  { %v1728_v50 = vmax.f32 %v452_v40, 0.0  ;;  %v501_v52 = vadd.f32 %v500_v47, %v499_v45  ;;  %v553_v53 = vadd.f32 %v552_v42, %v551_v43  ;;  %v556_v63 = vsel %vm271_vm2, %v530_v44, 0.0 }
 0x1db   :  { %v1402_v54 = vpop.f32.mrb[14].mxu1  ;;  %v554_v56 = vsel %vm271_vm2, %v529_v48, 0.0  ;;  %v1734_v57 = vmax.f32 %v447_v51, 0.0 }
 0x1dc   :  { %v456_v58 = vpop.f32.mrb[15].mxu1  ;;  %v555_v59 = vadd.f32 %v554_v56, %v553_v53  ;;  %v503_v60 = vadd.f32 %v502_v55, %v501_v52  ;;  %v462_v61 = vadd.f32 %v1402_v54, %v1633_v17  ;;  %v532_v2 = vmul.f32 %v1728_v50, %v1728_v50 }
 0x1dd   :  { %v457_v62 = vadd.f32 %v1633_v17, %v456_v58  ;;  %v504_v3 = vsel %vm271_vm2, %v1734_v57, 0.0  ;;  %v531_v4 = vmul.f32 %v1734_v57, %v1734_v57  ;;  %v506_v17 = vsel %vm271_vm2, %v1728_v50, 0.0 }
 0x1de   :  { %v505_v5 = vadd.f32 %v504_v3, %v503_v60  ;;  %v557_v6 = vadd.f32 %v556_v63, %v555_v59  ;;  %v1745_v7 = vmax.f32 %v462_v61, 0.0  ;;  %v560_v12 = vsel %vm271_vm2, %v532_v2, 0.0 }
 0x1df   :  { %v1747_v8 = vmax.f32 %v457_v62, 0.0  ;;  %v558_v9 = vsel %vm271_vm2, %v531_v4, 0.0 }
 0x1e0   :  { %v559_v10 = vadd.f32 %v558_v9, %v557_v6  ;;  %v507_v11 = vadd.f32 %v506_v17, %v505_v5  ;;  %v534_v14 = vmul.f32 %v1745_v7, %v1745_v7  ;;  %v510_v20 = vsel %vm271_vm2, %v1745_v7, 0.0 }
 0x1e1   :  { %v508_v15 = vsel %vm271_vm2, %v1747_v8, 0.0  ;;  %v533_v16 = vmul.f32 %v1747_v8, %v1747_v8 }
 0x1e2   :  { %v509_v18 = vadd.f32 %v508_v15, %v507_v11  ;;  %v561_v19 = vadd.f32 %v560_v12, %v559_v10  ;;  %v564_v27 = vsel %vm271_vm2, %v534_v14, 0.0  ;;  %v1240_v11 = vld [vmem:[%s2023_s2 + $0x20] sm:$0xff]  ;;  %v1241_v12 = vld [vmem:[%s2023_s2 + $0x28] sm:$0xff] }
 0x1e3   :  { %v562_v24 = vsel %vm271_vm2, %v533_v16, 0.0  ;;  %v1479_v14 = vpack.c.bf16 %v1241_v12, %v1240_v11  ;;  %v1804_v15 = vld [vmem:[%s2024_s3 + $0x2] ss:$0 sm:$0xff] }
 0x1e4   :  { %v511_v25 = vadd.f32 %v510_v20, %v509_v18  ;;  %v563_v26 = vadd.f32 %v562_v24, %v561_v19 }
 0x1e5   :  { %1480 = vmatprep.subr.bf16.mxu0 %v1479_v14  ;;  %1483 = vmatprep.subr.bf16.mxu1 %v1479_v14 }
 0x1e6   :  { %v512_v28 = vrot.slane %v511_v25, 4  ;;  %v565_v29 = vadd.f32 %v564_v27, %v563_v26  ;;  %1482 = vmatpush3.bf16.msra.mxu0 %v1479_v14 }
 0x1e8   :  { %v513_v30 = vadd.f32 %v512_v28, %v511_v25  ;;  %v566_v31 = vrot.slane %v565_v29, 4 }
 0x1ea   :  { %v514_v32 = vrot.slane %v513_v30, 2  ;;  %v567_v37 = vadd.f32 %v566_v31, %v565_v29 }
 0x1ec   :  { %v515_v38 = vadd.f32 %v514_v32, %v513_v30  ;;  %v568_v39 = vrot.slane %v567_v37, 2 }
 0x1ee   :  { %v516_v40 = vrot.slane %v515_v38, 1  ;;  %v569_v41 = vadd.f32 %v568_v39, %v567_v37 }
 0x1f0   :  { %v517_v42 = vadd.f32 %v516_v40, %v515_v38  ;;  %v570_v43 = vrot.slane %v569_v41, 1 }
 0x1f2   :  { %v518_v44 = vmul.f32 0.0078125, %v517_v42  ;;  %v571_v45 = vadd.f32 %v570_v43, %v569_v41 }
 0x1f4   :  { %v572_v47 = vmul.f32 0.0078125, %v571_v45  ;;  %v573_v48 = vmul.f32 %v518_v44, %v518_v44  ;;  %v592_v51 = vsub.f32 %v1747_v8, %v518_v44  ;;  %v578_v52 = vsub.f32 %v1639_v23, %v518_v44 }
 0x1f5   :  { %v579_v53 = vsub.f32 %v1637_v22, %v518_v44  ;;  %v580_v54 = vsub.f32 %v1655_v36, %v518_v44  ;;  %v581_v55 = vsub.f32 %v1652_v34, %v518_v44  ;;  %v582_v56 = vsub.f32 %v1670_v49, %v518_v44 }
 0x1f6   :  { %v574_v58 = vsub.f32 %v572_v47, %v573_v48  ;;  %v583_v59 = vsub.f32 %v1665_v46, %v518_v44  ;;  %v584_v60 = vsub.f32 %v1686_v1, %v518_v44  ;;  %v585_v61 = vsub.f32 %v1684_v0, %v518_v44 }
 0x1f7   :  { %v586_v62 = vsub.f32 %v1703_v21, %v518_v44  ;;  %v587_v63 = vsub.f32 %v1696_v13, %v518_v44  ;;  %v588_v23 = vsub.f32 %v1715_v35, %v518_v44  ;;  %v589_v22 = vsub.f32 %v1713_v33, %v518_v44 }
 0x1f8   :  { %v575_v36 = vmax.f32 %v574_v58, 0.0  ;;  %v590_v34 = vsub.f32 %v1734_v57, %v518_v44  ;;  %v591_v49 = vsub.f32 %v1728_v50, %v518_v44  ;;  %v593_v2 = vsub.f32 %v1745_v7, %v518_v44 }
 0x1fa   :  { %v576_v46 = vadd.f32 1e-05, %v575_v36 }
 0x1fc   :  { %1485 = vrsqrt.f32 %v576_v46 }
 0x206   :  { %v1486_v1 = vpop.eup %1485 }
 0x207   :  { %v594_v3 = vmul.f32 %v1486_v1, %v578_v52  ;;  %v595_v0 = vmul.f32 %v1486_v1, %v579_v53  ;;  %v596_v4 = vmul.f32 %v1486_v1, %v580_v54  ;;  %v597_v21 = vmul.f32 %v1486_v1, %v581_v55 }
 0x208   :  { %v598_v5 = vmul.f32 %v1486_v1, %v582_v56  ;;  %v599_v13 = vmul.f32 %v1486_v1, %v583_v59  ;;  %v600_v6 = vmul.f32 %v1486_v1, %v584_v60  ;;  %v601_v35 = vmul.f32 %v1486_v1, %v585_v61 }
 0x209   :  { %1407 = vmatprep.mubr.msk.f32.mxu1 %vm271_vm2, %v594_v3  ;;  %v602_v33 = vmul.f32 %v1486_v1, %v586_v62  ;;  %v603_v8 = vmul.f32 %v1486_v1, %v587_v63  ;;  %v604_v57 = vmul.f32 %v1486_v1, %v588_v23  ;;  %v605_v17 = vmul.f32 %v1486_v1, %v589_v22 }
 0x20a   :  { %1408 = vmatmul.mubr.msk.f32.vlgmr.msra.gmra.mrb[16].mxu1 %vm271_vm2, %v595_v0  ;;  %v606_v50 = vmul.f32 %v1486_v1, %v590_v34  ;;  %v607_v7 = vmul.f32 %v1486_v1, %v591_v49  ;;  %v608_v9 = vmul.f32 %v1486_v1, %v592_v51  ;;  %v609_v10 = vmul.f32 %v1486_v1, %v593_v2 }
 0x20b   :  { %1410 = vmatprep.mubr.msk.f32.mxu1 %vm271_vm2, %v596_v4  ;;  %1484 = vmatpush3.bf16.msra.mxu1 %v1479_v14 }
 0x20e   :  { %1411 = vmatmul.mubr.msk.f32.gmra.mrb[18].mxu1 %vm271_vm2, %v597_v21 }
 0x20f   :  { %1413 = vmatprep.mubr.msk.f32.mxu1 %vm271_vm2, %v598_v5 }
 0x212   :  { %1414 = vmatmul.mubr.msk.f32.gmra.mrb[20].mxu1 %vm271_vm2, %v599_v13 }
 0x213   :  { %1416 = vmatprep.mubr.msk.f32.mxu1 %vm271_vm2, %v600_v6 }
 0x216   :  { %1417 = vmatmul.mubr.msk.f32.gmra.mrb[22].mxu1 %vm271_vm2, %v601_v35 }
 0x217   :  { %1419 = vmatprep.mubr.msk.f32.mxu1 %vm271_vm2, %v602_v33 }
 0x21a   :  { %1420 = vmatmul.mubr.msk.f32.gmra.mrb[24].mxu1 %vm271_vm2, %v603_v8 }
 0x21b   :  { %1422 = vmatprep.mubr.msk.f32.mxu1 %vm271_vm2, %v604_v57 }
 0x21e   :  { %1423 = vmatmul.mubr.msk.f32.gmra.mrb[26].mxu1 %vm271_vm2, %v605_v17 }
 0x21f   :  { %1425 = vmatprep.mubr.msk.f32.mxu1 %vm271_vm2, %v606_v50 }
 0x222   :  { %1426 = vmatmul.mubr.msk.f32.gmra.mrb[28].mxu1 %vm271_vm2, %v607_v7 }
 0x223   :  { %1428 = vmatprep.mubr.msk.f32.mxu1 %vm271_vm2, %v608_v9 }
 0x226   :  { %1429 = vmatmul.mubr.msk.f32.gmra.mrb[30].mxu1 %vm271_vm2, %v609_v10 }
 0x2dd   :  { %v1409_v16 = vpop.f32.mrb[16].mxu1 }
 0x2de   :  { %v741_v18 = vadd.f32 %v1409_v16, %v1804_v15  ;;  %v735_v19 = vpop.f32.mrb[17].mxu1 }
 0x2df   :  { %v736_v20 = vadd.f32 %v1804_v15, %v735_v19 }
 0x2e0   :  { %v1808_v24 = vmax.f32 %v741_v18, 0.0 }
 0x2e1   :  { %v1810_v25 = vmax.f32 %v736_v20, 0.0  ;;  %v1412_v26 = vpop.f32.mrb[18].mxu1 }
 0x2e2   :  { %v831_v27 = vsel %vm271_vm2, %v1808_v24, 0.0  ;;  %v869_v28 = vmul.f32 %v1808_v24, %v1808_v24  ;;  %v751_v29 = vadd.f32 %v1412_v26, %v1804_v15  ;;  %v745_v30 = vpop.f32.mrb[19].mxu1 }
 0x2e3   :  { %v830_v31 = vsel %vm271_vm2, %v1810_v25, 0.0  ;;  %v868_v32 = vmul.f32 %v1810_v25, %v1810_v25  ;;  %v746_v37 = vadd.f32 %v1804_v15, %v745_v30 }
 0x2e4   :  { %v885_v38 = vsel %vm271_vm2, %v869_v28, 0.0  ;;  %v832_v39 = vadd.f32 %v831_v27, %v830_v31  ;;  %v1823_v40 = vmax.f32 %v751_v29, 0.0 }
 0x2e5   :  { %v884_v41 = vsel %vm271_vm2, %v868_v32, 0.0  ;;  %v1826_v42 = vmax.f32 %v746_v37, 0.0  ;;  %v1415_v43 = vpop.f32.mrb[20].mxu1 }
 0x2e6   :  { %v886_v44 = vadd.f32 %v885_v38, %v884_v41  ;;  %v871_v45 = vmul.f32 %v1823_v40, %v1823_v40  ;;  %v761_v47 = vadd.f32 %v1415_v43, %v1804_v15  ;;  %v755_v48 = vpop.f32.mrb[21].mxu1  ;;  %v835_v56 = vsel %vm271_vm2, %v1823_v40, 0.0 }
 0x2e7   :  { %v833_v51 = vsel %vm271_vm2, %v1826_v42, 0.0  ;;  %v870_v52 = vmul.f32 %v1826_v42, %v1826_v42  ;;  %v756_v53 = vadd.f32 %v1804_v15, %v755_v48 }
 0x2e8   :  { %v834_v54 = vadd.f32 %v833_v51, %v832_v39  ;;  %v1836_v55 = vmax.f32 %v761_v47, 0.0  ;;  %v889_v61 = vsel %vm271_vm2, %v871_v45, 0.0 }
 0x2e9   :  { %v887_v58 = vsel %vm271_vm2, %v870_v52, 0.0  ;;  %v1841_v59 = vmax.f32 %v756_v53, 0.0  ;;  %v1418_v60 = vpop.f32.mrb[22].mxu1 }
 0x2ea   :  { %v888_v62 = vadd.f32 %v887_v58, %v886_v44  ;;  %v873_v63 = vmul.f32 %v1836_v55, %v1836_v55  ;;  %v836_v23 = vadd.f32 %v835_v56, %v834_v54  ;;  %v765_v22 = vpop.f32.mrb[23].mxu1  ;;  %v771_v49 = vadd.f32 %v1418_v60, %v1804_v15 }
 0x2eb   :  { %v837_v36 = vsel %vm271_vm2, %v1841_v59, 0.0  ;;  %v872_v34 = vmul.f32 %v1841_v59, %v1841_v59  ;;  %v766_v2 = vadd.f32 %v1804_v15, %v765_v22  ;;  %v839_v3 = vsel %vm271_vm2, %v1836_v55, 0.0 }
 0x2ec   :  { %v838_v46 = vadd.f32 %v837_v36, %v836_v23  ;;  %v890_v1 = vadd.f32 %v889_v61, %v888_v62  ;;  %v1855_v4 = vmax.f32 %v771_v49, 0.0  ;;  %v893_v8 = vsel %vm271_vm2, %v873_v63, 0.0 }
 0x2ed   :  { %v891_v0 = vsel %vm271_vm2, %v872_v34, 0.0  ;;  %v1857_v21 = vmax.f32 %v766_v2, 0.0  ;;  %v1421_v5 = vpop.f32.mrb[24].mxu1 }
 0x2ee   :  { %v892_v13 = vadd.f32 %v891_v0, %v890_v1  ;;  %v840_v6 = vadd.f32 %v839_v3, %v838_v46  ;;  %v781_v35 = vadd.f32 %v1421_v5, %v1804_v15  ;;  %v775_v33 = vpop.f32.mrb[25].mxu1  ;;  %v875_v57 = vmul.f32 %v1855_v4, %v1855_v4 }
 0x2ef   :  { %v841_v17 = vsel %vm271_vm2, %v1857_v21, 0.0  ;;  %v874_v50 = vmul.f32 %v1857_v21, %v1857_v21  ;;  %v776_v11 = vadd.f32 %v1804_v15, %v775_v33  ;;  %v843_v16 = vsel %vm271_vm2, %v1855_v4, 0.0 }
 0x2f0   :  { %v842_v7 = vadd.f32 %v841_v17, %v840_v6  ;;  %v894_v9 = vadd.f32 %v893_v8, %v892_v13  ;;  %v1867_v10 = vmax.f32 %v781_v35, 0.0  ;;  %v897_v18 = vsel %vm271_vm2, %v875_v57, 0.0 }
 0x2f1   :  { %v895_v12 = vsel %vm271_vm2, %v874_v50, 0.0  ;;  %v1424_v14 = vpop.f32.mrb[26].mxu1  ;;  %v1874_v20 = vmax.f32 %v776_v11, 0.0 }
 0x2f2   :  { %v896_v19 = vadd.f32 %v895_v12, %v894_v9  ;;  %v785_v26 = vpop.f32.mrb[27].mxu1  ;;  %v877_v27 = vmul.f32 %v1867_v10, %v1867_v10  ;;  %v844_v28 = vadd.f32 %v843_v16, %v842_v7  ;;  %v791_v29 = vadd.f32 %v1424_v14, %v1804_v15 }
 0x2f3   :  { %v786_v30 = vadd.f32 %v1804_v15, %v785_v26  ;;  %v845_v31 = vsel %vm271_vm2, %v1874_v20, 0.0  ;;  %v876_v32 = vmul.f32 %v1874_v20, %v1874_v20  ;;  %v847_v44 = vsel %vm271_vm2, %v1867_v10, 0.0 }
 0x2f4   :  { %v898_v37 = vadd.f32 %v897_v18, %v896_v19  ;;  %v846_v38 = vadd.f32 %v845_v31, %v844_v28  ;;  %v1884_v39 = vmax.f32 %v791_v29, 0.0  ;;  %v901_v51 = vsel %vm271_vm2, %v877_v27, 0.0 }
 0x2f5   :  { %v1886_v41 = vmax.f32 %v786_v30, 0.0  ;;  %v1427_v43 = vpop.f32.mrb[28].mxu1  ;;  %v899_v45 = vsel %vm271_vm2, %v876_v32, 0.0 }
 0x2f6   :  { %v801_v47 = vadd.f32 %v1427_v43, %v1804_v15  ;;  %v795_v48 = vpop.f32.mrb[29].mxu1  ;;  %v900_v52 = vadd.f32 %v899_v45, %v898_v37  ;;  %v879_v53 = vmul.f32 %v1884_v39, %v1884_v39  ;;  %v848_v54 = vadd.f32 %v847_v44, %v846_v38 }
 0x2f7   :  { %v849_v56 = vsel %vm271_vm2, %v1886_v41, 0.0  ;;  %v878_v58 = vmul.f32 %v1886_v41, %v1886_v41  ;;  %v796_v61 = vadd.f32 %v1804_v15, %v795_v48  ;;  %v851_v22 = vsel %vm271_vm2, %v1884_v39, 0.0 }
 0x2f8   :  { %v1899_v60 = vmax.f32 %v801_v47, 0.0  ;;  %v850_v62 = vadd.f32 %v849_v56, %v848_v54  ;;  %v902_v63 = vadd.f32 %v901_v51, %v900_v52  ;;  %v905_v0 = vsel %vm271_vm2, %v879_v53, 0.0 }
 0x2f9   :  { %v1430_v23 = vpop.f32.mrb[30].mxu1  ;;  %v903_v36 = vsel %vm271_vm2, %v878_v58, 0.0  ;;  %v1905_v34 = vmax.f32 %v796_v61, 0.0 }
 0x2fa   :  { %v805_v49 = vpop.f32.mrb[31].mxu1  ;;  %v904_v2 = vadd.f32 %v903_v36, %v902_v63  ;;  %v852_v46 = vadd.f32 %v851_v22, %v850_v62  ;;  %v811_v1 = vadd.f32 %v1430_v23, %v1804_v15  ;;  %v881_v5 = vmul.f32 %v1899_v60, %v1899_v60 }
 0x2fb   :  { %v806_v3 = vadd.f32 %v1804_v15, %v805_v49  ;;  %v853_v13 = vsel %vm271_vm2, %v1905_v34, 0.0  ;;  %v880_v6 = vmul.f32 %v1905_v34, %v1905_v34  ;;  %v855_v17 = vsel %vm271_vm2, %v1899_v60, 0.0 }
 0x2fc   :  { %v854_v35 = vadd.f32 %v853_v13, %v852_v46  ;;  %v906_v33 = vadd.f32 %v905_v0, %v904_v2  ;;  %v829_v8 = vmax.f32 %v811_v1, 0.0  ;;  %v909_v9 = vsel %vm271_vm2, %v881_v5, 0.0 }
 0x2fd   :  { %v828_v57 = vmax.f32 %v806_v3, 0.0  ;;  %v907_v15 = vsel %vm271_vm2, %v880_v6, 0.0 }
 0x2fe   :  { %v908_v50 = vadd.f32 %v907_v15, %v906_v33  ;;  %v856_v7 = vadd.f32 %v855_v17, %v854_v35  ;;  %v883_v11 = vmul.f32 %v829_v8, %v829_v8  ;;  %v859_v19 = vsel %vm271_vm2, %v829_v8, 0.0 }
 0x2ff   :  { %v857_v12 = vsel %vm271_vm2, %v828_v57, 0.0  ;;  %v882_v14 = vmul.f32 %v828_v57, %v828_v57 }
 0x300   :  { %v858_v16 = vadd.f32 %v857_v12, %v856_v7  ;;  %v910_v18 = vadd.f32 %v909_v9, %v908_v50  ;;  %v913_v29 = vsel %vm271_vm2, %v883_v11, 0.0  ;;  %v1243_v7 = vld [vmem:[%s2024_s3 + $0x3] ss:$0 sm:$0xff] }
 0x301   :  { %v911_v26 = vsel %vm271_vm2, %v882_v14, 0.0 }
 0x302   :  { %v860_v27 = vadd.f32 %v859_v19, %v858_v16  ;;  %v912_v28 = vadd.f32 %v911_v26, %v910_v18 }
 0x304   :  { %v861_v30 = vrot.slane %v860_v27, 4  ;;  %v914_v31 = vadd.f32 %v913_v29, %v912_v28 }
 0x306   :  { %v862_v32 = vadd.f32 %v861_v30, %v860_v27  ;;  %v915_v37 = vrot.slane %v914_v31, 4 }
 0x308   :  { %v863_v38 = vrot.slane %v862_v32, 2  ;;  %v916_v43 = vadd.f32 %v915_v37, %v914_v31 }
 0x30a   :  { %v864_v44 = vadd.f32 %v863_v38, %v862_v32  ;;  %v917_v45 = vrot.slane %v916_v43, 2 }
 0x30c   :  { %v865_v47 = vrot.slane %v864_v44, 1  ;;  %v918_v48 = vadd.f32 %v917_v45, %v916_v43 }
 0x30e   :  { %v866_v51 = vadd.f32 %v865_v47, %v864_v44  ;;  %v919_v52 = vrot.slane %v918_v48, 1 }
 0x310   :  { %v867_v53 = vmul.f32 0.0078125, %v866_v51  ;;  %v920_v54 = vadd.f32 %v919_v52, %v918_v48 }
 0x312   :  { %v921_v56 = vmul.f32 0.0078125, %v920_v54  ;;  %v922_v58 = vmul.f32 %v867_v53, %v867_v53  ;;  %v941_v61 = vsub.f32 %v828_v57, %v867_v53  ;;  %v927_v62 = vsub.f32 %v1810_v25, %v867_v53 }
 0x313   :  { %v928_v63 = vsub.f32 %v1808_v24, %v867_v53  ;;  %v942_v23 = vsub.f32 %v829_v8, %v867_v53  ;;  %v929_v22 = vsub.f32 %v1826_v42, %v867_v53  ;;  %v930_v36 = vsub.f32 %v1823_v40, %v867_v53 }
 0x314   :  { %v923_v49 = vsub.f32 %v921_v56, %v922_v58  ;;  %v931_v2 = vsub.f32 %v1841_v59, %v867_v53  ;;  %v932_v46 = vsub.f32 %v1836_v55, %v867_v53  ;;  %v933_v1 = vsub.f32 %v1857_v21, %v867_v53 }
 0x315   :  { %v934_v3 = vsub.f32 %v1855_v4, %v867_v53  ;;  %v935_v0 = vsub.f32 %v1874_v20, %v867_v53  ;;  %v936_v25 = vsub.f32 %v1867_v10, %v867_v53  ;;  %v937_v24 = vsub.f32 %v1886_v41, %v867_v53 }
 0x316   :  { %v924_v5 = vmax.f32 %v923_v49, 0.0  ;;  %v938_v42 = vsub.f32 %v1884_v39, %v867_v53  ;;  %v939_v40 = vsub.f32 %v1905_v34, %v867_v53  ;;  %v940_v13 = vsub.f32 %v1899_v60, %v867_v53 }
 0x318   :  { %v925_v59 = vadd.f32 1e-05, %v924_v5 }
 0x31a   :  { %1487 = vrsqrt.f32 %v925_v59 }
 0x324   :  { %v1488_v55 = vpop.eup %1487 }
 0x325   :  { %v943_v6 = vmul.f32 %v1488_v55, %v927_v62  ;;  %v957_v21 = vmul.f32 %v1488_v55, %v941_v61  ;;  %v944_v35 = vmul.f32 %v1488_v55, %v928_v63  ;;  %v958_v4 = vmul.f32 %v1488_v55, %v942_v23 }
 0x326   :  { %v945_v33 = vmul.f32 %v1488_v55, %v929_v22  ;;  %v946_v20 = vmul.f32 %v1488_v55, %v930_v36  ;;  %v947_v8 = vmul.f32 %v1488_v55, %v931_v2  ;;  %v948_v10 = vmul.f32 %v1488_v55, %v932_v46 }
 0x327   :  { %1435 = vmatprep.mubr.msk.f32.mxu0 %vm271_vm2, %v943_v6  ;;  %1456 = vmatprep.mubr.msk.f32.mxu1 %vm271_vm2, %v957_v21  ;;  %v949_v39 = vmul.f32 %v1488_v55, %v933_v1  ;;  %v950_v41 = vmul.f32 %v1488_v55, %v934_v3  ;;  %v951_v34 = vmul.f32 %v1488_v55, %v935_v0 }
 0x328   :  { %1436 = vmatmul.mubr.msk.f32.vlgmr.msra.gmra.mrb[16].mxu0 %vm271_vm2, %v944_v35  ;;  %1457 = vmatmul.mubr.msk.f32.vlgmr.msra.gmra.mrb[32].mxu1 %vm271_vm2, %v958_v4  ;;  %v952_v60 = vmul.f32 %v1488_v55, %v936_v25  ;;  %v953_v57 = vmul.f32 %v1488_v55, %v937_v24  ;;  %v954_v17 = vmul.f32 %v1488_v55, %v938_v42 }
 0x329   :  { %1438 = vmatprep.mubr.msk.f32.mxu0 %vm271_vm2, %v945_v33  ;;  %v955_v15 = vmul.f32 %v1488_v55, %v939_v40  ;;  %v956_v50 = vmul.f32 %v1488_v55, %v940_v13 }
 0x32c   :  { %1439 = vmatmul.mubr.msk.f32.gmra.mrb[18].mxu0 %vm271_vm2, %v946_v20 }
 0x32d   :  { %1441 = vmatprep.mubr.msk.f32.mxu0 %vm271_vm2, %v947_v8 }
 0x330   :  { %1442 = vmatmul.mubr.msk.f32.gmra.mrb[20].mxu0 %vm271_vm2, %v948_v10 }
 0x331   :  { %1444 = vmatprep.mubr.msk.f32.mxu0 %vm271_vm2, %v949_v39 }
 0x334   :  { %1445 = vmatmul.mubr.msk.f32.gmra.mrb[22].mxu0 %vm271_vm2, %v950_v41 }
 0x335   :  { %1447 = vmatprep.mubr.msk.f32.mxu0 %vm271_vm2, %v951_v34 }
 0x338   :  { %1448 = vmatmul.mubr.msk.f32.gmra.mrb[24].mxu0 %vm271_vm2, %v952_v60 }
 0x339   :  { %1450 = vmatprep.mubr.msk.f32.mxu0 %vm271_vm2, %v953_v57 }
 0x33c   :  { %1451 = vmatmul.mubr.msk.f32.gmra.mrb[26].mxu0 %vm271_vm2, %v954_v17 }
 0x33d   :  { %1453 = vmatprep.mubr.msk.f32.mxu0 %vm271_vm2, %v955_v15 }
 0x340   :  { %1454 = vmatmul.mubr.msk.f32.gmra.mrb[28].mxu0 %vm271_vm2, %v956_v50 }
 0x3fb   :  { %v1437_v9 = vpop.f32.mrb[16].mxu0  ;;  %v1458_v11 = vpop.f32.mrb[32].mxu1 }
 0x3fc   :  { %v1090_v12 = vadd.f32 %v1437_v9, %v1243_v7  ;;  %v1160_v14 = vadd.f32 %v1458_v11, %v1243_v7  ;;  %v1084_v16 = vpop.f32.mrb[17].mxu0  ;;  %v1154_v18 = vpop.f32.mrb[33].mxu1 }
 0x3fd   :  { %v1085_v19 = vadd.f32 %v1243_v7, %v1084_v16  ;;  %v1155_v26 = vadd.f32 %v1243_v7, %v1154_v18 }
 0x3fe   :  { %1165 = vst.msk [vmem:[%s2025_s4 + $0x8] sm:$0xff] %vm1163_vm3, %v1090_v12  ;;  %1179 = vst.msk [vmem:[%s2025_s4 + $0x78] sm:$0xff] %vm1163_vm3, %v1160_v14 }
 0x3ff   :  { %1164 = vst.msk [vmem:[%s2025_s4] sm:$0xff] %vm1163_vm3, %v1085_v19  ;;  %1178 = vst.msk [vmem:[%s2025_s4 + $0x70] sm:$0xff] %vm1163_vm3, %v1155_v26  ;;  %v1440_v27 = vpop.f32.mrb[18].mxu0 }
 0x400   :  { %v1100_v28 = vadd.f32 %v1440_v27, %v1243_v7  ;;  %v1094_v29 = vpop.f32.mrb[19].mxu0 }
 0x401   :  { %v1095_v30 = vadd.f32 %v1243_v7, %v1094_v29 }
 0x402   :  { %1167 = vst.msk [vmem:[%s2025_s4 + $0x18] sm:$0xff] %vm1163_vm3, %v1100_v28 }
 0x403   :  { %1166 = vst.msk [vmem:[%s2025_s4 + $0x10] sm:$0xff] %vm1163_vm3, %v1095_v30  ;;  %v1443_v31 = vpop.f32.mrb[20].mxu0 }
 0x404   :  { %v1110_v32 = vadd.f32 %v1443_v31, %v1243_v7  ;;  %v1104_v37 = vpop.f32.mrb[21].mxu0 }
 0x405   :  { %v1105_v38 = vadd.f32 %v1243_v7, %v1104_v37 }
 0x406   :  { %1169 = vst.msk [vmem:[%s2025_s4 + $0x28] sm:$0xff] %vm1163_vm3, %v1110_v32 }
 0x407   :  { %1168 = vst.msk [vmem:[%s2025_s4 + $0x20] sm:$0xff] %vm1163_vm3, %v1105_v38  ;;  %v1446_v43 = vpop.f32.mrb[22].mxu0 }
 0x408   :  { %v1120_v44 = vadd.f32 %v1446_v43, %v1243_v7  ;;  %v1114_v45 = vpop.f32.mrb[23].mxu0 }
 0x409   :  { %v1115_v47 = vadd.f32 %v1243_v7, %v1114_v45 }
 0x40a   :  { %1171 = vst.msk [vmem:[%s2025_s4 + $0x38] sm:$0xff] %vm1163_vm3, %v1120_v44 }
 0x40b   :  { %1170 = vst.msk [vmem:[%s2025_s4 + $0x30] sm:$0xff] %vm1163_vm3, %v1115_v47  ;;  %v1449_v48 = vpop.f32.mrb[24].mxu0 }
 0x40c   :  { %v1130_v51 = vadd.f32 %v1449_v48, %v1243_v7  ;;  %v1124_v52 = vpop.f32.mrb[25].mxu0 }
 0x40d   :  { %v1125_v53 = vadd.f32 %v1243_v7, %v1124_v52 }
 0x40e   :  { %1173 = vst.msk [vmem:[%s2025_s4 + $0x48] sm:$0xff] %vm1163_vm3, %v1130_v51 }
 0x40f   :  { %1172 = vst.msk [vmem:[%s2025_s4 + $0x40] sm:$0xff] %vm1163_vm3, %v1125_v53  ;;  %v1452_v54 = vpop.f32.mrb[26].mxu0 }
 0x410   :  { %v1140_v56 = vadd.f32 %v1452_v54, %v1243_v7  ;;  %v1134_v58 = vpop.f32.mrb[27].mxu0 }
 0x411   :  { %v1135_v61 = vadd.f32 %v1243_v7, %v1134_v58 }
 0x412   :  { %1175 = vst.msk [vmem:[%s2025_s4 + $0x58] sm:$0xff] %vm1163_vm3, %v1140_v56 }
 0x413   :  { %1174 = vst.msk [vmem:[%s2025_s4 + $0x50] sm:$0xff] %vm1163_vm3, %v1135_v61  ;;  %v1455_v62 = vpop.f32.mrb[28].mxu0 }
 0x414   :  { %v1150_v63 = vadd.f32 %v1455_v62, %v1243_v7  ;;  %v1144_v23 = vpop.f32.mrb[29].mxu0 }
 0x415   :  { %v1145_v22 = vadd.f32 %v1243_v7, %v1144_v23 }
 0x416   :  { %1177 = vst.msk [vmem:[%s2025_s4 + $0x68] sm:$0xff] %vm1163_vm3, %v1150_v63 }
 0x417   :  { %1176 = vst.msk [vmem:[%s2025_s4 + $0x60] sm:$0xff] %vm1163_vm3, %v1145_v22 }

</bundles_post_ra>
